<compile_context>
chip_gen: v7x
topology: tpu7x:2x2x1
jax: 0.10.0
libtpu: 0.0.40
codegen_flags: <defaults>
</compile_context>

<pallas_src>
import jax
import jax.numpy as jnp
from jax.experimental import pallas as pl
from jax.experimental.pallas import tpu as pltpu

IN_DIM = 4
HID_DIM = 100
OUT_DIM = 3

IN_PAD = 8      # 4   -> 8   sublane-aligned contraction dim for layer 1
HID_PAD = 128   # 100 -> 128 aligned hidden dim
OUT_PAD = 8     # 3   -> 8   sublane-aligned logits rows (sliced before store)


def mlp_kernel(xt_ref, w1t_ref, b1t_ref, w2t_ref, b2t_ref, w3t_ref, b3t_ref,
               ot_ref):
    """One batch tile of the 3-layer MLP, computed in transposed orientation.

    All activations are [features, batch_tile] so the batch lives on the lane
    axis; each MXU matmul is dot(W^T [F_out, F_in], h^T [F_in, tile]).
    """
    xt = xt_ref[...]                                               # [8, tile] bf16

    # Layer 1: h1^T = relu(W1^T @ x^T + b1)             -> [128, tile]
    h1 = jnp.dot(w1t_ref[...], xt, preferred_element_type=jnp.float32)
    h1 = jnp.maximum(h1 + b1t_ref[...], 0.0).astype(jnp.bfloat16)

    # Layer 2: h2^T = relu(W2^T @ h1^T + b2)            -> [128, tile]
    h2 = jnp.dot(w2t_ref[...], h1, preferred_element_type=jnp.float32)
    h2 = jnp.maximum(h2 + b2t_ref[...], 0.0).astype(jnp.bfloat16)

    # Layer 3: logits^T = W3^T @ h2^T + b3              -> [8, tile] -> [3, tile]
    logits = jnp.dot(w3t_ref[...], h2, preferred_element_type=jnp.float32)
    ot_ref[...] = (logits[:OUT_DIM, :] + b3t_ref[...]).astype(ot_ref.dtype)


def _cdiv(a, b):
    return -(-a // b)


def _round_up(n, m):
    return _cdiv(n, m) * m


def _tpu_defaults():
    """Generation-aware (tile_b, vmem_limit_bytes)."""
    conservative = (4096, 48 * 1024 * 1024)        # fits v7x's 64 MiB VMEM
    try:
        kind = jax.devices()[0].device_kind.lower()
    except Exception:
        return conservative
    if "v7" in kind or "7x" in kind:
        return 4096, 48 * 1024 * 1024              # 64 MiB physical VMEM
    if "v4" in kind or "v5" in kind or "v6" in kind:
        return 8192, 96 * 1024 * 1024              # 128 MiB physical VMEM
    return conservative


def multiclass_classification(x, prepared_params, tile_b=None):
    """x: [B, 4] float32 -> logits [B, 3] float32.

    `prepared_params` must come from prepare_params() (transposed, padded)."""
    w1t, b1t, w2t, b2t, w3t, b3t = prepared_params
    B = x.shape[0]

    default_tile, vmem_limit = _tpu_defaults()
    if tile_b is None:
        tile_b = default_tile
    tile_b = max(128, _round_up(int(tile_b), 128))

    # Grid-step count: big tiles amortize per-step overhead; use >=2 steps for
    # moderate batches so both TensorCores work on v7x (no-op on v5e/v6e).
    n_steps = _cdiv(B, tile_b)
    if n_steps == 1 and B > 128:
        n_steps = 2
    tile = _round_up(_cdiv(B, n_steps), 128)
    b_pad = tile * n_steps
    grid = (n_steps,)

    # Single fused wrapper pass over x: transpose to [4, B], pad to [8, b_pad],
    # cast to bf16.  Batch now lives on the 128-lane axis.
    x_t = jnp.zeros((IN_PAD, b_pad), jnp.bfloat16)
    x_t = x_t.at[:IN_DIM, :B].set(x.astype(jnp.bfloat16).T)

    def resident(a):   # full-array block + constant index_map -> VMEM-resident
        return pl.BlockSpec(a.shape, lambda i: (0, 0))

    out_t = pl.pallas_call(
        mlp_kernel,
        out_shape=jax.ShapeDtypeStruct((OUT_DIM, b_pad), jnp.float32),
        grid=grid,
        in_specs=[
            pl.BlockSpec((IN_PAD, tile), lambda i: (0, i)),   # streamed x tiles
            resident(w1t), resident(b1t),
            resident(w2t), resident(b2t),
            resident(w3t), resident(b3t),
        ],
        out_specs=pl.BlockSpec((OUT_DIM, tile), lambda i: (0, i)),  # lane-dense
        compiler_params=pltpu.CompilerParams(
            dimension_semantics=("parallel",),
            vmem_limit_bytes=vmem_limit),
    )(x_t, w1t, b1t, w2t, b2t, w3t, b3t)

    return out_t[:, :B].T                           # back to [B, 3]


def init_params(key):
    """Deterministic init mimicking nn.Linear's uniform(-1/sqrt(in), 1/sqrt(in)).

    Logical (unpadded) params, weights stored as [in, out], biases [1, out]."""
    def linear(key, fan_in, fan_out):
        kw, kb = jax.random.split(key)
        bound = 1.0 / jnp.sqrt(jnp.float32(fan_in))
        w = jax.random.uniform(kw, (fan_in, fan_out), jnp.float32, -bound, bound)
        b = jax.random.uniform(kb, (1, fan_out), jnp.float32, -bound, bound)
        return w, b

    k1, k2, k3 = jax.random.split(key, 3)
    w1, b1 = linear(k1, IN_DIM, HID_DIM)
    w2, b2 = linear(k2, HID_DIM, HID_DIM)
    w3, b3 = linear(k3, HID_DIM, OUT_DIM)
    return (w1, b1, w2, b2, w3, b3)


def prepare_params(params):
    """One-time transpose + padding to aligned shapes; weights bf16, biases f32."""
    w1, b1, w2, b2, w3, b3 = params

    def pad2(a, shape):
        return jnp.zeros(shape, a.dtype).at[: a.shape[0], : a.shape[1]].set(a)

    w1t = pad2(w1.T, (HID_PAD, IN_PAD)).astype(jnp.bfloat16)    # [128, 8]
    w2t = pad2(w2.T, (HID_PAD, HID_PAD)).astype(jnp.bfloat16)   # [128, 128]
    w3t = pad2(w3.T, (OUT_PAD, HID_PAD)).astype(jnp.bfloat16)   # [8, 128]
    b1t = pad2(b1.T, (HID_PAD, 1)).astype(jnp.float32)          # [128, 1]
    b2t = pad2(b2.T, (HID_PAD, 1)).astype(jnp.float32)          # [128, 1]
    b3t = b3.T.astype(jnp.float32)                              # [3, 1]
    return (w1t, b1t, w2t, b2t, w3t, b3t)


def reference_forward(x, params):
    """Pure-f32 reference matching the PyTorch module."""
    w1, b1, w2, b2, w3, b3 = params
    h1 = jnp.maximum(x @ w1 + b1, 0.0)
    h2 = jnp.maximum(h1 @ w2 + b2, 0.0)
    return h2 @ w3 + b3


def reference_forward_bf16(x, params):
    """Reference that mimics the kernel's bf16-input / f32-accumulate numerics."""
    w1, b1, w2, b2, w3, b3 = params
    bf = jnp.bfloat16
    h1 = jnp.dot(x.astype(bf), w1.astype(bf), preferred_element_type=jnp.float32) + b1
    h1 = jnp.maximum(h1, 0.0).astype(bf)
    h2 = jnp.dot(h1, w2.astype(bf), preferred_element_type=jnp.float32) + b2
    h2 = jnp.maximum(h2, 0.0).astype(bf)
    return jnp.dot(h2, w3.astype(bf), preferred_element_type=jnp.float32) + b3


if __name__ == "__main__":
    key = jax.random.PRNGKey(0)
    kx_small, kx_big, kp = jax.random.split(key, 3)

    params = init_params(kp)
    prepared = prepare_params(params)

    # --- small batch: single grid step (tile = 128) --------------------------
    x_small = jax.random.normal(kx_small, (8, IN_DIM), dtype=jnp.float32)
    out_small = jax.block_until_ready(multiclass_classification(x_small, prepared))
    assert out_small.shape == (8, OUT_DIM), out_small.shape
    assert jnp.allclose(out_small, reference_forward_bf16(x_small, params),
                        atol=2e-3, rtol=2e-3), "mismatch vs bf16 reference (small)"
    assert jnp.allclose(out_small, reference_forward(x_small, params),
                        atol=1e-1, rtol=1e-1), "mismatch vs f32 reference (small)"

    # --- tiled path: explicit small tile -> 4 grid steps + ragged tail -------
    x_big = jax.random.normal(kx_big, (1000, IN_DIM), dtype=jnp.float32)
    out_big = jax.block_until_ready(
        multiclass_classification(x_big, prepared, tile_b=256))
    assert out_big.shape == (1000, OUT_DIM), out_big.shape
    assert jnp.allclose(out_big, reference_forward_bf16(x_big, params),
                        atol=2e-3, rtol=2e-3), "mismatch vs bf16 reference (big)"
    assert jnp.allclose(out_big, reference_forward(x_big, params),
                        atol=1e-1, rtol=1e-1), "mismatch vs f32 reference (big)"

    # --- generation-aware default tile: >=2 parallel steps for moderate B ----
    out_auto = jax.block_until_ready(multiclass_classification(x_big, prepared))
    assert out_auto.shape == (1000, OUT_DIM), out_auto.shape
    assert jnp.allclose(out_auto, reference_forward_bf16(x_big, params),
                        atol=2e-3, rtol=2e-3), "mismatch vs bf16 reference (auto)"

    print("KERNEL_OK")
</pallas_src>

<mosaic_0001>
module attributes {stable_mosaic.version = 11 : i64} {
  func.func @mlp_kernel(%arg0: i32, %arg1: memref<8x128xbf16, #tpu.memory_space<vmem>>, %arg2: memref<128x8xbf16, #tpu.memory_space<vmem>>, %arg3: memref<128x1xf32, #tpu.memory_space<vmem>>, %arg4: memref<128x128xbf16, #tpu.memory_space<vmem>>, %arg5: memref<128x1xf32, #tpu.memory_space<vmem>>, %arg6: memref<8x128xbf16, #tpu.memory_space<vmem>>, %arg7: memref<3x1xf32, #tpu.memory_space<vmem>>, %arg8: memref<3x128xf32, #tpu.memory_space<vmem>>) attributes {dimension_semantics = [#tpu.dimension_semantics<parallel>], iteration_bounds = array<i64: 1>, scalar_prefetch = 0 : i64, scratch_operands = 0 : i64, tpu.core_type = #tpu.core_type<tc>, window_params = [{transform_indices = @transform_0, window_bounds = array<i64: 8, 128>}, {pipeline_mode = #tpu.pipeline_mode<synchronous>, transform_indices = @transform_1, window_bounds = array<i64: 128, 8>}, {pipeline_mode = #tpu.pipeline_mode<synchronous>, transform_indices = @transform_2, window_bounds = array<i64: 128, 1>}, {pipeline_mode = #tpu.pipeline_mode<synchronous>, transform_indices = @transform_3, window_bounds = array<i64: 128, 128>}, {pipeline_mode = #tpu.pipeline_mode<synchronous>, transform_indices = @transform_4, window_bounds = array<i64: 128, 1>}, {pipeline_mode = #tpu.pipeline_mode<synchronous>, transform_indices = @transform_5, window_bounds = array<i64: 8, 128>}, {pipeline_mode = #tpu.pipeline_mode<synchronous>, transform_indices = @transform_6, window_bounds = array<i64: 3, 1>}, {transform_indices = @transform_7, window_bounds = array<i64: 3, 128>}]} {
    %c0 = arith.constant 0 : index
    %c0_0 = arith.constant 0 : index
    %0 = vector.load %arg1[%c0, %c0_0] : memref<8x128xbf16, #tpu.memory_space<vmem>>, vector<8x128xbf16>
    %c0_1 = arith.constant 0 : index
    %c0_2 = arith.constant 0 : index
    %1 = vector.load %arg2[%c0_1, %c0_2] : memref<128x8xbf16, #tpu.memory_space<vmem>>, vector<128x8xbf16>
    %cst = arith.constant dense<0.000000e+00> : vector<128x128xf32>
    %2 = tpu.matmul %1, %0, %cst {dimension_numbers = #tpu.dot_dimension_numbers<[1], [0], [0], [1], [0, 0, 1, 1], [], []>} : vector<128x8xbf16>, vector<8x128xbf16>, vector<128x128xf32> -> vector<128x128xf32>
    %c0_3 = arith.constant 0 : index
    %c0_4 = arith.constant 0 : index
    %3 = vector.load %arg3[%c0_3, %c0_4] : memref<128x1xf32, #tpu.memory_space<vmem>>, vector<128x1xf32>
    %4 = vector.broadcast %3 : vector<128x1xf32> to vector<128x128xf32>
    %5 = arith.addf %2, %4 : vector<128x128xf32>
    %cst_5 = arith.constant 0.000000e+00 : f32
    %6 = vector.broadcast %cst_5 : f32 to vector<128x128xf32>
    %7 = arith.maximumf %5, %6 : vector<128x128xf32>
    %8 = arith.truncf %7 : vector<128x128xf32> to vector<128x128xbf16>
    %c0_6 = arith.constant 0 : index
    %c0_7 = arith.constant 0 : index
    %9 = vector.load %arg4[%c0_6, %c0_7] : memref<128x128xbf16, #tpu.memory_space<vmem>>, vector<128x128xbf16>
    %cst_8 = arith.constant dense<0.000000e+00> : vector<128x128xf32>
    %10 = tpu.matmul %9, %8, %cst_8 {dimension_numbers = #tpu.dot_dimension_numbers<[1], [0], [0], [1], [0, 0, 1, 1], [], []>} : vector<128x128xbf16>, vector<128x128xbf16>, vector<128x128xf32> -> vector<128x128xf32>
    %c0_9 = arith.constant 0 : index
    %c0_10 = arith.constant 0 : index
    %11 = vector.load %arg5[%c0_9, %c0_10] : memref<128x1xf32, #tpu.memory_space<vmem>>, vector<128x1xf32>
    %12 = vector.broadcast %11 : vector<128x1xf32> to vector<128x128xf32>
    %13 = arith.addf %10, %12 : vector<128x128xf32>
    %cst_11 = arith.constant 0.000000e+00 : f32
    %14 = vector.broadcast %cst_11 : f32 to vector<128x128xf32>
    %15 = arith.maximumf %13, %14 : vector<128x128xf32>
    %16 = arith.truncf %15 : vector<128x128xf32> to vector<128x128xbf16>
    %c0_12 = arith.constant 0 : index
    %c0_13 = arith.constant 0 : index
    %17 = vector.load %arg6[%c0_12, %c0_13] : memref<8x128xbf16, #tpu.memory_space<vmem>>, vector<8x128xbf16>
    %cst_14 = arith.constant dense<0.000000e+00> : vector<8x128xf32>
    %18 = tpu.matmul %17, %16, %cst_14 {dimension_numbers = #tpu.dot_dimension_numbers<[1], [0], [0], [1], [0, 0, 1, 1], [], []>} : vector<8x128xbf16>, vector<128x128xbf16>, vector<8x128xf32> -> vector<8x128xf32>
    %19 = vector.extract_strided_slice %18 {offsets = [0, 0], sizes = [3, 128], strides = [1, 1]} : vector<8x128xf32> to vector<3x128xf32>
    %c0_15 = arith.constant 0 : index
    %c0_16 = arith.constant 0 : index
    %20 = vector.load %arg7[%c0_15, %c0_16] : memref<3x1xf32, #tpu.memory_space<vmem>>, vector<3x1xf32>
    %21 = vector.broadcast %20 : vector<3x1xf32> to vector<3x128xf32>
    %22 = arith.addf %19, %21 : vector<3x128xf32>
    %c0_17 = arith.constant 0 : index
    %c0_18 = arith.constant 0 : index
    %23 = vector.load %arg8[%c0_17, %c0_18] : memref<3x128xf32, #tpu.memory_space<vmem>>, vector<3x128xf32>
    tpu.vector_store %arg8[%c0_17, %c0_18], %22 {strides = array<i32>} : memref<3x128xf32, #tpu.memory_space<vmem>>, vector<3x128xf32>,
    return
  }
  func.func @transform_0(%arg0: i32) -> (i32, i32) {
    %c0_i32 = arith.constant 0 : i32
    %c0_i32_0 = arith.constant 0 : i32
    return %c0_i32, %arg0 : i32, i32
  }
  func.func @transform_1(%arg0: i32) -> (i32, i32) {
    %c0_i32 = arith.constant 0 : i32
    %c0_i32_0 = arith.constant 0 : i32
    %c0_i32_1 = arith.constant 0 : i32
    return %c0_i32, %c0_i32_0 : i32, i32
  }
  func.func @transform_2(%arg0: i32) -> (i32, i32) {
    %c0_i32 = arith.constant 0 : i32
    %c0_i32_0 = arith.constant 0 : i32
    %c0_i32_1 = arith.constant 0 : i32
    return %c0_i32, %c0_i32_0 : i32, i32
  }
  func.func @transform_3(%arg0: i32) -> (i32, i32) {
    %c0_i32 = arith.constant 0 : i32
    %c0_i32_0 = arith.constant 0 : i32
    %c0_i32_1 = arith.constant 0 : i32
    return %c0_i32, %c0_i32_0 : i32, i32
  }
  func.func @transform_4(%arg0: i32) -> (i32, i32) {
    %c0_i32 = arith.constant 0 : i32
    %c0_i32_0 = arith.constant 0 : i32
    %c0_i32_1 = arith.constant 0 : i32
    return %c0_i32, %c0_i32_0 : i32, i32
  }
  func.func @transform_5(%arg0: i32) -> (i32, i32) {
    %c0_i32 = arith.constant 0 : i32
    %c0_i32_0 = arith.constant 0 : i32
    %c0_i32_1 = arith.constant 0 : i32
    return %c0_i32, %c0_i32_0 : i32, i32
  }
  func.func @transform_6(%arg0: i32) -> (i32, i32) {
    %c0_i32 = arith.constant 0 : i32
    %c0_i32_0 = arith.constant 0 : i32
    %c0_i32_1 = arith.constant 0 : i32
    return %c0_i32, %c0_i32_0 : i32, i32
  }
  func.func @transform_7(%arg0: i32) -> (i32, i32) {
    %c0_i32 = arith.constant 0 : i32
    %c0_i32_0 = arith.constant 0 : i32
    return %c0_i32, %arg0 : i32, i32
  }
}

</mosaic_0001>

<bundles_post_ra>
// kernel: tpu_custom_call.1
= control target key start
LH: loop header
LB: loop body
LE: loop exit
PB: predicated region body
PF: predicated region fallthrough
CT: control target
= control target key end

     0   :  { %vm206_vm0 = vcmask 1043456   ;;  %vm181_vm1 = vcmask 64512   ;;  %v850_v5 = vmov 0   ;;  %s1076_s0 = inlined_call_operand.vmem [shape: bf16[8,128], index: 0, kind: input, shape index: {}]   ;;  %s1077_s1 = inlined_call_operand.vmem [shape: bf16[128,8], index: 1, kind: input, shape index: {}]   ;;  %s1078_s2 = inlined_call_operand.vmem [shape: f32[128,1], index: 2, kind: input, shape index: {}]   ;;  %s1079_s3 = inlined_call_operand.vmem [shape: bf16[128,128], index: 3, kind: input, shape index: {}]   ;;  %s1080_s4 = inlined_call_operand.vmem [shape: f32[128,1], index: 4, kind: input, shape index: {}]   ;;  %s1081_s5 = inlined_call_operand.vmem [shape: bf16[8,128], index: 5, kind: input, shape index: {}]   ;;  %s1082_s6 = inlined_call_operand.vmem [shape: f32[3,1], index: 6, kind: input, shape index: {}]   ;;  %s1083_s7 = inlined_call_operand.hbm [shape: f32[3,128], index: 7, kind: output, shape index: {}]  }
   0x1   :  { %v28_v0 = vld [vmem:[%s1076_s0] sm:$0xf]  ;;  %v811_v3 = vld [vmem:[%s1077_s1 + $0x8] sm:$0xff]   ;;  %v812_v4 = vld [vmem:[%s1077_s1 + $0x10] sm:$0xff]   ;;  %808 = vset.pattern.permute.xlu0 %v850_v5  ;;  %809 = vset.pattern.permute.xlu1 %v850_v5 }
   0x2   :  { %v810_v1 = vld [vmem:[%s1077_s1] sm:$0xff]   ;;  %803 = vmatprep.subr.msk.bf16.mxu0 %vm206_vm0, %v28_v0  ;;  %v208_v2 = vsel %vm206_vm0, %v28_v0, 0  ;;  %v46_v7 = vld [vmem:[%s1078_s2 + $0x8] sm:$0xff]  ;;  %v813_v8 = vld [vmem:[%s1077_s1 + $0x18] sm:$0xff]  }
   0x3   :  { %734 = vmatpush3.bf16.msra.mxu0 %v208_v2  ;;  %735 = vmatprep.mubr.msk.bf16.mxu0 %vm181_vm1, %v810_v1  ;;  %v45_v6 = vld [vmem:[%s1078_s2] sm:$0xff]  ;;  %v47_v9 = vld [vmem:[%s1078_s2 + $0x10] sm:$0xff]  ;;  %v48_v11 = vld [vmem:[%s1078_s2 + $0x18] sm:$0xff] }
   0x4   :  { %63 = vperm.xlu0 %808, %v45_v6   ;;  %v814_v10 = vld [vmem:[%s1077_s1 + $0x20] sm:$0xff]   ;;  %73 = vperm.xlu1 %809, %v47_v9   ;;  %v50_v13 = vld [vmem:[%s1078_s2 + $0x28] sm:$0xff]  ;;  %v51_v14 = vld [vmem:[%s1078_s2 + $0x30] sm:$0xff] }
   0x5   :  { %v49_v12 = vld [vmem:[%s1078_s2 + $0x20] sm:$0xff]  ;;  %v815_v15 = vld [vmem:[%s1077_s1 + $0x28] sm:$0xff]   ;;  %v816_v16 = vld [vmem:[%s1077_s1 + $0x30] sm:$0xff]  }
   0x6   :  { %736 = vmatmul.mubr.msk.bf16.vlgmr.msra.gmra.mrb[0].mxu0 %vm181_vm1, %v811_v3  ;;  %v53_v17 = vld [vmem:[%s1078_s2 + $0x40] sm:$0xff]  ;;  %v52_v18 = vld [vmem:[%s1078_s2 + $0x38] sm:$0xff]  ;;  %v54_v19 = vld [vmem:[%s1078_s2 + $0x48] sm:$0xff] }
   0x7   :  { %739 = vmatprep.mubr.msk.bf16.mxu0 %vm181_vm1, %v812_v4  ;;  %v55_v20 = vld [vmem:[%s1078_s2 + $0x50] sm:$0xff]  ;;  %v817_v21 = vld [vmem:[%s1077_s1 + $0x38] sm:$0xff]  }
   0x8   :  { %68 = vperm.xlu0 %808, %v46_v7   ;;  %78 = vperm.xlu1 %809, %v48_v11  }
   0xc   :  { %83 = vperm.xlu0 %808, %v49_v12   ;;  %88 = vperm.xlu1 %809, %v50_v13  }
   0xe   :  { %740 = vmatmul.mubr.msk.bf16.gmra.mrb[4].mxu0 %vm181_vm1, %v813_v8 }
   0xf   :  { %743 = vmatprep.mubr.msk.bf16.mxu0 %vm181_vm1, %v814_v10 }
  0x10   :  { %93 = vperm.xlu0 %808, %v51_v14   ;;  %98 = vperm.xlu1 %809, %v52_v18  }
  0x14   :  { %103 = vperm.xlu0 %808, %v53_v17  }
  0x16   :  { %744 = vmatmul.mubr.msk.bf16.gmra.mrb[8].mxu0 %vm181_vm1, %v815_v15 }
  0x17   :  { %747 = vmatprep.mubr.msk.bf16.mxu0 %vm181_vm1, %v816_v16 }
  0x18   :  { %12 = vsyncpa [#allocation3], 0  ;;  %108 = vperm.xlu1 %809, %v54_v19   ;;  %113 = vperm.xlu0 %808, %v55_v20   ;;  %v56_v22 = vld [vmem:[%s1078_s2 + $0x58] sm:$0xff]  ;;  %v57_v23 = vld [vmem:[%s1078_s2 + $0x60] sm:$0xff]  ;;  %vm852_vm2 = vmmov 0   ;;  %s853_s22 = smov [#allocation2]  }
  0x19   :  { %v58_v24 = vld [vmem:[%s1078_s2 + $0x68] sm:$0xff]  ;;  %v59_v25 = vld [vmem:[%s1078_s2 + $0x70] sm:$0xff]  ;;  %v60_v26 = vld [vmem:[%s1078_s2 + $0x78] sm:$0xff]  ;;  %s667_s23 = sshll.u32 %s853_s22, 4  ;;  %s668_s23 = int_to_ptr.vmem [resolvable:$true] %s667_s23 }
  0x1a   :  { %v347_v27 = vld [vmem:[%s1080_s4] sm:$0xff]  ;;  %v348_v28 = vld [vmem:[%s1080_s4 + $0x8] sm:$0xff]  ;;  %v349_v29 = vld [vmem:[%s1080_s4 + $0x10] sm:$0xff]  ;;  %s826_s24 = scalar_lea.vmem %s668_s23, 64  ;;  %p831_p1 = scmp.lt.s32.totalorder %s668_s23, %s668_s23 }
  0x1b   :  { %v350_v30 = vld [vmem:[%s1080_s4 + $0x18] sm:$0xff]  ;;  %v351_v31 = vld [vmem:[%s1080_s4 + $0x20] sm:$0xff]  ;;  %v352_v32 = vld [vmem:[%s1080_s4 + $0x28] sm:$0xff]  ;;  %p827_p0 = scmp.ne.s32.totalorder %s668_s23, %s826_s24  ;;  %p832_p2 = scmp.lt.s32.totalorder %s826_s24, %s826_s24 }
  0x1c   :  { %118 = vperm.xlu1 %809, %v56_v22   ;;  %123 = vperm.xlu0 %808, %v57_v23   ;;  %v353_v33 = vld [vmem:[%s1080_s4 + $0x30] sm:$0xff]  ;;  %v354_v34 = vld [vmem:[%s1080_s4 + $0x38] sm:$0xff]  ;;  %v355_v35 = vld [vmem:[%s1080_s4 + $0x40] sm:$0xff] }
  0x1d   :  { %v356_v36 = vld [vmem:[%s1080_s4 + $0x48] sm:$0xff]  ;;  %v357_v37 = vld [vmem:[%s1080_s4 + $0x50] sm:$0xff]  ;;  %v358_v38 = vld [vmem:[%s1080_s4 + $0x58] sm:$0xff]  ;;  %p833_p3 = por %p832_p2, %p831_p1 }
  0x1e   :  { %748 = vmatmul.mubr.msk.bf16.gmra.mrb[12].mxu0 %vm181_vm1, %v817_v21  ;;  %v359_v39 = vld [vmem:[%s1080_s4 + $0x60] sm:$0xff]  ;;  %v360_v40 = vld [vmem:[%s1080_s4 + $0x68] sm:$0xff]  ;;  %v361_v41 = vld [vmem:[%s1080_s4 + $0x70] sm:$0xff] }
  0x1f   :  { %v362_v42 = vld [vmem:[%s1080_s4 + $0x78] sm:$0xff]  ;;  %v653_v43 = vld [vmem:[%s1082_s6] sm:$0x7]  ;;  %p834_p4 = pnand %p833_p3, %p827_p0 }
  0x20   :  { %128 = vperm.xlu1 %809, %v58_v24   ;;  %133 = vperm.xlu0 %808, %v59_v25   ;;  %v818_v44 = vld [vmem:[%s1079_s3] sm:$0xff]  }
  0x21   :  { %767 = vmatprep.mubr.bf16.mxu1 %v818_v44 }
  0x24   :  { %138 = vperm.xlu1 %809, %v60_v26   ;;  %365 = vperm.xlu0 %808, %v347_v27  }
  0x28   :  { %370 = vperm.xlu1 %809, %v348_v28   ;;  %375 = vperm.xlu0 %808, %v349_v29  }
  0x2c   :  { %380 = vperm.xlu1 %809, %v350_v30   ;;  %385 = vperm.xlu0 %808, %v351_v31  }
  0x30   :  { %390 = vperm.xlu1 %809, %v352_v32   ;;  %395 = vperm.xlu0 %808, %v353_v33  }
  0x34   :  { %400 = vperm.xlu1 %809, %v354_v34   ;;  %405 = vperm.xlu0 %808, %v355_v35  }
  0x38   :  { %410 = vperm.xlu1 %809, %v356_v36   ;;  %415 = vperm.xlu0 %808, %v357_v37  }
  0x3c   :  { %420 = vperm.xlu1 %809, %v358_v38   ;;  %425 = vperm.xlu0 %808, %v359_v39  }
  0x40   :  { %430 = vperm.xlu1 %809, %v360_v40   ;;  %435 = vperm.xlu0 %808, %v361_v41  }
  0x44   :  { %440 = vperm.xlu1 %809, %v362_v42   ;;  %656 = vperm.xlu0 %808, %v653_v43  }
  0x83   :  { %v64_v45 = vpop.permute.xlu0 %63  ;;  %v74_v46 = vpop.permute.xlu1 %73 }
  0x87   :  { %v69_v47 = vpop.permute.xlu0 %68  ;;  %v79_v48 = vpop.permute.xlu1 %78 }
  0x8b   :  { %v84_v49 = vpop.permute.xlu0 %83  ;;  %v89_v50 = vpop.permute.xlu1 %88 }
  0x8f   :  { %v94_v51 = vpop.permute.xlu0 %93  ;;  %v99_v55 = vpop.permute.xlu1 %98 }
  0x93   :  { %v104_v63 = vpop.permute.xlu0 %103 }
  0x97   :  { %v109_v3 = vpop.permute.xlu1 %108  ;;  %v114_v12 = vpop.permute.xlu0 %113 }
  0x9b   :  { %v119_v16 = vpop.permute.xlu1 %118  ;;  %v124_v24 = vpop.permute.xlu0 %123 }
  0x9f   :  { %v129_v29 = vpop.permute.xlu1 %128  ;;  %v134_v36 = vpop.permute.xlu0 %133 }
  0xa3   :  { %v139_v41 = vpop.permute.xlu1 %138 }
  0xd9   :  { %v737_v52 = vpop.f32.mrb[0].mxu0 }
  0xda   :  { %v253_v53 = vadd.f32 %v737_v52, %v74_v46  ;;  %v244_v54 = vpop.f32.mrb[1].mxu0 }
  0xdb   :  { %v245_v56 = vadd.f32 %v244_v54, %v64_v45  ;;  %v738_v57 = vpop.f32.mrb[2].mxu0  ;;  %v820_v54 = vld [vmem:[%s1079_s3 + $0x10] sm:$0xff]  }
  0xdc   :  { %v256_v58 = vadd.f32 %v738_v57, %v79_v48  ;;  %v247_v59 = vpop.f32.mrb[3].mxu0  ;;  %v309_v61 = vmax.f32 %v253_v53, 0.0  ;;  %v819_v53 = vld [vmem:[%s1079_s3 + $0x8] sm:$0xff]  }
  0xdd   :  { %v248_v60 = vadd.f32 %v247_v59, %v69_v47  ;;  %v307_v0 = vmax.f32 %v245_v56, 0.0  ;;  %v822_v56 = vld [vmem:[%s1079_s3 + $0x20] sm:$0xff]   ;;  %v823_v57 = vld [vmem:[%s1079_s3 + $0x28] sm:$0xff]   ;;  %v825_v59 = vld [vmem:[%s1079_s3 + $0x38] sm:$0xff]  }
  0xde   :  { %v310_v62 = vmax.f32 %v256_v58, 0.0  ;;  %v824_v58 = vld [vmem:[%s1079_s3 + $0x30] sm:$0xff]  }
  0xdf   :  { %v308_v1 = vmax.f32 %v248_v60, 0.0  ;;  %v851_v60 = vmov 0.0  }
  0xe0   :  { %v324_v2 = vpack.c.bf16 %v310_v62, %v309_v61  ;;  %783 = vmatprep.subr.bf16.mxu0 %v851_v60  ;;  %799 = vmatprep.mubr.msk.bf16.mxu0 %vm852_vm2, %v851_v60  ;;  %v366_v61 = vpop.permute.xlu0 %365  ;;  %v371_v62 = vpop.permute.xlu1 %370 }
  0xe1   :  { %v741_v4 = vpop.f32.mrb[4].mxu0  ;;  %v323_v5 = vpack.c.bf16 %v308_v1, %v307_v0 }
  0xe2   :  { %v269_v6 = vadd.f32 %v741_v4, %v94_v51  ;;  %v260_v7 = vpop.f32.mrb[5].mxu0 }
  0xe3   :  { %v261_v8 = vadd.f32 %v260_v7, %v84_v49  ;;  %v742_v9 = vpop.f32.mrb[6].mxu0  ;;  %751 = vmatprep.subr.bf16.mxu1 %v323_v5 }
  0xe4   :  { %v272_v10 = vadd.f32 %v742_v9, %v99_v55  ;;  %v263_v11 = vpop.f32.mrb[7].mxu0  ;;  %752 = vmatpush3.bf16.msra.mxu1 %v323_v5  ;;  %v313_v14 = vmax.f32 %v269_v6, 0.0  ;;  %v821_v55 = vld [vmem:[%s1079_s3 + $0x18] sm:$0xff]   ;;  %v381_v0 = vpop.permute.xlu1 %380 }
  0xe5   :  { %v264_v13 = vadd.f32 %v263_v11, %v89_v50  ;;  %753 = vmatprep.subr.bf16.mxu1 %v324_v2  ;;  %v311_v17 = vmax.f32 %v261_v8, 0.0 }
  0xe6   :  { %v314_v15 = vmax.f32 %v272_v10, 0.0 }
  0xe7   :  { %v312_v18 = vmax.f32 %v264_v13, 0.0 }
  0xe8   :  { %v326_v19 = vpack.c.bf16 %v314_v15, %v313_v14  ;;  %754 = vmatpush3.bf16.msra.mxu1 %v324_v2  ;;  %v391_v2 = vpop.permute.xlu1 %390 }
  0xe9   :  { %v325_v20 = vpack.c.bf16 %v312_v18, %v311_v17  ;;  %v745_v21 = vpop.f32.mrb[8].mxu0 }
  0xea   :  { %v285_v22 = vadd.f32 %v745_v21, %v114_v12  ;;  %v276_v23 = vpop.f32.mrb[9].mxu0 }
  0xeb   :  { %v277_v25 = vadd.f32 %v276_v23, %v104_v63  ;;  %v746_v26 = vpop.f32.mrb[10].mxu0  ;;  %755 = vmatprep.subr.bf16.mxu1 %v325_v20  ;;  %v376_v63 = vpop.permute.xlu0 %375 }
  0xec   :  { %v288_v27 = vadd.f32 %v746_v26, %v119_v16  ;;  %v279_v28 = vpop.f32.mrb[11].mxu0  ;;  %756 = vmatpush3.bf16.msra.mxu1 %v325_v20  ;;  %v317_v31 = vmax.f32 %v285_v22, 0.0  ;;  %v401_v7 = vpop.permute.xlu1 %400 }
  0xed   :  { %v280_v30 = vadd.f32 %v279_v28, %v109_v3  ;;  %757 = vmatprep.subr.bf16.mxu1 %v326_v19  ;;  %v315_v33 = vmax.f32 %v277_v25, 0.0 }
  0xee   :  { %v318_v32 = vmax.f32 %v288_v27, 0.0 }
  0xef   :  { %v316_v34 = vmax.f32 %v280_v30, 0.0  ;;  %v386_v1 = vpop.permute.xlu0 %385 }
  0xf0   :  { %v328_v35 = vpack.c.bf16 %v318_v32, %v317_v31  ;;  %758 = vmatpush3.bf16.msra.mxu1 %v326_v19  ;;  %v411_v19 = vpop.permute.xlu1 %410 }
  0xf1   :  { %v327_v37 = vpack.c.bf16 %v316_v34, %v315_v33  ;;  %v749_v38 = vpop.f32.mrb[12].mxu0 }
  0xf2   :  { %v301_v39 = vadd.f32 %v749_v38, %v134_v36  ;;  %v292_v40 = vpop.f32.mrb[13].mxu0 }
  0xf3   :  { %v293_v42 = vadd.f32 %v292_v40, %v124_v24  ;;  %v750_v43 = vpop.f32.mrb[14].mxu0  ;;  %759 = vmatprep.subr.bf16.mxu1 %v327_v37  ;;  %v396_v3 = vpop.permute.xlu0 %395 }
  0xf4   :  { %v304_v44 = vadd.f32 %v750_v43, %v139_v41  ;;  %v295_v45 = vpop.f32.mrb[15].mxu0  ;;  %760 = vmatpush3.bf16.msra.mxu1 %v327_v37  ;;  %v321_v47 = vmax.f32 %v301_v39, 0.0  ;;  %v421_v32 = vpop.permute.xlu1 %420 }
  0xf5   :  { %v296_v46 = vadd.f32 %v295_v45, %v129_v29  ;;  %761 = vmatprep.subr.bf16.mxu1 %v328_v35  ;;  %v319_v49 = vmax.f32 %v293_v42, 0.0 }
  0xf6   :  { %v322_v48 = vmax.f32 %v304_v44, 0.0 }
  0xf7   :  { %v320_v50 = vmax.f32 %v296_v46, 0.0  ;;  %v406_v15 = vpop.permute.xlu0 %405 }
  0xf8   :  { %v330_v51 = vpack.c.bf16 %v322_v48, %v321_v47  ;;  %762 = vmatpush3.bf16.msra.mxu1 %v328_v35  ;;  %v431_v45 = vpop.permute.xlu1 %430 }
  0xf9   :  { %v329_v52 = vpack.c.bf16 %v320_v50, %v319_v49 }
  0xfb   :  { %763 = vmatprep.subr.bf16.mxu1 %v329_v52  ;;  %v416_v28 = vpop.permute.xlu0 %415 }
  0xfc   :  { %764 = vmatpush3.bf16.msra.mxu1 %v329_v52 }
  0xfd   :  { %765 = vmatprep.subr.bf16.mxu1 %v330_v51 }
  0xff   :  { %v426_v40 = vpop.permute.xlu0 %425 }
 0x100   :  { %766 = vmatpush3.bf16.msra.mxu1 %v330_v51 }
 0x103   :  { %768 = vmatmul.mubr.bf16.vlgmr.msra.gmra.mrb[0].mxu1 %v819_v53  ;;  %v436_v52 = vpop.permute.xlu0 %435 }
 0x104   :  { %771 = vmatprep.mubr.bf16.mxu1 %v820_v54 }
 0x10b   :  { %772 = vmatmul.mubr.bf16.gmra.mrb[4].mxu1 %v821_v55 }
 0x10c   :  { %775 = vmatprep.mubr.bf16.mxu1 %v822_v56 }
 0x113   :  { %776 = vmatmul.mubr.bf16.gmra.mrb[8].mxu1 %v823_v57  ;;  %v441_v57 = vpop.permute.xlu1 %440 }
 0x114   :  { %779 = vmatprep.mubr.bf16.mxu1 %v824_v58 }
 0x11b   :  { %780 = vmatmul.mubr.bf16.gmra.mrb[12].mxu1 %v825_v59 }
 0x1d6   :  { %v769_v4 = vpop.f32.mrb[0].mxu1 }
 0x1d7   :  { %v534_v5 = vadd.f32 %v769_v4, %v376_v63  ;;  %v525_v6 = vpop.f32.mrb[1].mxu1 }
 0x1d8   :  { %v526_v8 = vadd.f32 %v525_v6, %v366_v61  ;;  %v770_v9 = vpop.f32.mrb[2].mxu1  ;;  %v612_v6 = vld [vmem:[%s1081_s5] sm:$0xf] }
 0x1d9   :  { %v537_v10 = vadd.f32 %v770_v9, %v381_v0  ;;  %v528_v11 = vpop.f32.mrb[3].mxu1  ;;  %v590_v13 = vmax.f32 %v534_v5, 0.0 }
 0x1da   :  { %v529_v12 = vadd.f32 %v528_v11, %v371_v62  ;;  %v588_v16 = vmax.f32 %v526_v8, 0.0 }
 0x1db   :  { %v591_v14 = vmax.f32 %v537_v10, 0.0 }
 0x1dc   :  { %v589_v17 = vmax.f32 %v529_v12, 0.0 }
 0x1dd   :  { %v605_v18 = vpack.c.bf16 %v591_v14, %v590_v13 }
 0x1de   :  { %v604_v20 = vpack.c.bf16 %v589_v17, %v588_v16  ;;  %v773_v21 = vpop.f32.mrb[4].mxu1 }
 0x1df   :  { %v550_v22 = vadd.f32 %v773_v21, %v396_v3  ;;  %v541_v23 = vpop.f32.mrb[5].mxu1 }
 0x1e0   :  { %v542_v24 = vadd.f32 %v541_v23, %v386_v1  ;;  %v774_v25 = vpop.f32.mrb[6].mxu1  ;;  %784 = vmatpush3.bf16.msra.mxu0 %v604_v20 }
 0x1e1   :  { %v553_v26 = vadd.f32 %v774_v25, %v401_v7  ;;  %v544_v27 = vpop.f32.mrb[7].mxu1  ;;  %785 = vmatprep.subr.bf16.mxu0 %v851_v60  ;;  %v594_v30 = vmax.f32 %v550_v22, 0.0  ;;  %v657_v7 = vpop.permute.xlu0 %656 }
 0x1e2   :  { %v545_v29 = vadd.f32 %v544_v27, %v391_v2  ;;  %v592_v33 = vmax.f32 %v542_v24, 0.0 }
 0x1e3   :  { %v595_v31 = vmax.f32 %v553_v26, 0.0 }
 0x1e4   :  { %v593_v34 = vmax.f32 %v545_v29, 0.0  ;;  %786 = vmatpush3.bf16.msra.mxu0 %v605_v18 }
 0x1e5   :  { %v607_v35 = vpack.c.bf16 %v595_v31, %v594_v30  ;;  %787 = vmatprep.subr.bf16.mxu0 %v851_v60 }
 0x1e6   :  { %v606_v36 = vpack.c.bf16 %v593_v34, %v592_v33  ;;  %v777_v37 = vpop.f32.mrb[8].mxu1 }
 0x1e7   :  { %v566_v38 = vadd.f32 %v777_v37, %v416_v28  ;;  %v557_v39 = vpop.f32.mrb[9].mxu1 }
 0x1e8   :  { %v558_v41 = vadd.f32 %v557_v39, %v406_v15  ;;  %v778_v42 = vpop.f32.mrb[10].mxu1  ;;  %788 = vmatpush3.bf16.msra.mxu0 %v606_v36 }
 0x1e9   :  { %v569_v43 = vadd.f32 %v778_v42, %v421_v32  ;;  %v560_v44 = vpop.f32.mrb[11].mxu1  ;;  %789 = vmatprep.subr.bf16.mxu0 %v851_v60  ;;  %v598_v47 = vmax.f32 %v566_v38, 0.0 }
 0x1ea   :  { %v561_v46 = vadd.f32 %v560_v44, %v411_v19  ;;  %v596_v49 = vmax.f32 %v558_v41, 0.0 }
 0x1eb   :  { %v599_v48 = vmax.f32 %v569_v43, 0.0 }
 0x1ec   :  { %v597_v50 = vmax.f32 %v561_v46, 0.0  ;;  %790 = vmatpush3.bf16.msra.mxu0 %v607_v35 }
 0x1ed   :  { %v609_v51 = vpack.c.bf16 %v599_v48, %v598_v47  ;;  %791 = vmatprep.subr.bf16.mxu0 %v851_v60 }
 0x1ee   :  { %v608_v53 = vpack.c.bf16 %v597_v50, %v596_v49  ;;  %v781_v54 = vpop.f32.mrb[12].mxu1 }
 0x1ef   :  { %v582_v55 = vadd.f32 %v781_v54, %v436_v52  ;;  %v573_v56 = vpop.f32.mrb[13].mxu1 }
 0x1f0   :  { %v574_v58 = vadd.f32 %v573_v56, %v426_v40  ;;  %v782_v59 = vpop.f32.mrb[14].mxu1  ;;  %792 = vmatpush3.bf16.msra.mxu0 %v608_v53 }
 0x1f1   :  { %v585_v61 = vadd.f32 %v782_v59, %v441_v57  ;;  %v576_v62 = vpop.f32.mrb[15].mxu1  ;;  %793 = vmatprep.subr.bf16.mxu0 %v851_v60  ;;  %v602_v0 = vmax.f32 %v582_v55, 0.0 }
 0x1f2   :  { %v577_v63 = vadd.f32 %v576_v62, %v431_v45  ;;  %v600_v2 = vmax.f32 %v574_v58, 0.0 }
 0x1f3   :  { %v603_v1 = vmax.f32 %v585_v61, 0.0 }
 0x1f4   :  { %v601_v3 = vmax.f32 %v577_v63, 0.0  ;;  %794 = vmatpush3.bf16.msra.mxu0 %v609_v51 }
 0x1f5   :  { %v611_v4 = vpack.c.bf16 %v603_v1, %v602_v0  ;;  %795 = vmatprep.subr.bf16.mxu0 %v851_v60 }
 0x1f6   :  { %v610_v5 = vpack.c.bf16 %v601_v3, %v600_v2 }
 0x1f8   :  { %796 = vmatpush3.bf16.msra.mxu0 %v610_v5 }
 0x1f9   :  { %797 = vmatprep.subr.bf16.mxu0 %v851_v60 }
 0x1fc   :  { %798 = vmatpush3.bf16.msra.mxu0 %v611_v4 }
 0x1ff   :  { %800 = vmatmul.mubr.bf16.vlgmr.msra.gmra.mrb[16].mxu0 %v612_v6 }
 0x2d2   :  { %v647_v8 = vpop.f32.mrb[16].mxu0 }
 0x2d3   :  { %v659_v9 = vadd.f32 %v657_v7, %v647_v8  ;;  %v801_v10 = vpop.f32.mrb[17].mxu0 }
 0x2d4   :  { %v650_v11 = vpop.f32.mrb[18].mxu0 }
 0x2d5   :  { %660 = vst [vmem:[#allocation2] sm:$0x7] %v659_v9  ;;  %v802_v12 = vpop.f32.mrb[19].mxu0 }
 0x2d6   :  { %837 = shalt.err (!%p834_p4)
}
 0x2d7   :  { %s838_s26 = scalar_lea.hbm %s1083_s7, 64 }
 0x2d8   :  { %p839_p5 = scmp.ne.s32.totalorder %s1083_s7, %s838_s26  ;;  %p842_p6 = scmp.lt.u32.totalorder %s838_s26, %s1083_s7 }
 0x2da   :  { %p844_p7 = pnand %p842_p6, %p839_p5 }
 0x2dc   :  { %847 = shalt.err (!%p844_p7)
}
 0x2dd   :  { %670 = dma.vmem_to_hbm [thread:$0]  %s668_s23, 64, %s1083_s7, [#allocation3]  }
 0x2de   :  { %848 = dma.done.wait [#allocation3], 64  }
 0x2df   :  { %849 = vsyncadd [#allocation3], 4294967232 }
 0x2e0   :  { %674 = vsyncpa [#allocation3], 1 }

</bundles_post_ra>
